<compile_context>
chip_gen: v7x
topology: tpu7x:2x2x1
jax: 0.10.0
libtpu: 0.0.40
codegen_flags: <defaults>
</compile_context>

<pallas_src>
import functools

import jax
import jax.numpy as jnp
from jax import lax
from jax.experimental import pallas as pl
from jax.experimental.pallas import tpu as pltpu


# ---------------------------------------------------------------------------
# kernels
# ---------------------------------------------------------------------------

def _ce_nd_kernel(x_ref, t_ref, o_ref, *, tile_l, valid_l):
    """(B_TILE, C, TILE_L) tile; writes per-position CE losses (lane-dense)."""
    x = x_ref[...].astype(jnp.float32)            # (b, C, tile_l) class on sublanes
    t = t_ref[...].astype(jnp.int32)              # (b, 1, tile_l) targets (any int dtype)

    # numerically-stable log-softmax over the class (sublane) axis
    col_max = jnp.max(x, axis=1, keepdims=True)                        # (b, 1, tile_l)
    shifted = x - col_max                                              # (b, C, tile_l)
    lse = jnp.log(jnp.sum(jnp.exp(shifted), axis=1, keepdims=True))    # (b, 1, tile_l)

    # pick the target-class (shifted) logit via compare+select (no dyn gather)
    cls_ids = lax.broadcasted_iota(jnp.int32, x.shape, dimension=1)    # (b, C, tile_l)
    picked = jnp.sum(jnp.where(cls_ids == t, shifted, 0.0),
                     axis=1, keepdims=True)                            # (b, 1, tile_l)

    loss = lse - picked                                                # (b, 1, tile_l)

    if valid_l is not None:
        # partial edge block: mask out-of-bounds spatial positions.  Must stay
        # a where-select (not multiply): the OOB tail may hold NaN/Inf garbage.
        j = pl.program_id(1)
        pos = j * tile_l + lax.broadcasted_iota(jnp.int32, loss.shape, dimension=2)
        loss = jnp.where(pos < valid_l, loss, 0.0)

    o_ref[...] = loss                                                  # distinct block


def _ce_rowmajor_kernel(x_ref, t_ref, o_ref):
    """(TILE_B, C) tile, classes on lanes; writes one loss per row."""
    x = x_ref[...].astype(jnp.float32)            # (tile_b, C)
    t = t_ref[...].astype(jnp.int32)              # (tile_b, 1)

    row_max = jnp.max(x, axis=-1, keepdims=True)
    shifted = x - row_max
    lse = jnp.log(jnp.sum(jnp.exp(shifted), axis=-1, keepdims=True))

    cls_ids = lax.broadcasted_iota(jnp.int32, x.shape, dimension=1)
    picked = jnp.sum(jnp.where(cls_ids == t, shifted, 0.0),
                     axis=-1, keepdims=True)

    # OOB rows of a partial edge block are never written back (clamped DMA),
    # so no explicit mask is needed here.
    o_ref[...] = lse - picked


# ---------------------------------------------------------------------------
# tile sizing (generation-aware VMEM budget)
# ---------------------------------------------------------------------------

def _tpu_vmem_bytes():
    """Physical VMEM per core; conservative (v7x, 64 MiB) fallback."""
    try:
        info = pltpu.get_tpu_info()
        for attr in ("vmem_capacity_bytes", "vmem_bytes", "vmem_size_bytes"):
            v = getattr(info, attr, None)
            if v:
                return int(v)
    except Exception:
        pass
    return 64 * 1024 * 1024


def _choose_tiles_nd(n, c, l, x_bytes, t_bytes, budget_bytes):
    """Pick (b_tile, tile_l): b_tile divides n, tile_l is a multiple of 128."""
    # double-buffered VMEM bytes per (batch-row, lane-position)
    per_pos = 2 * (c * x_bytes + t_bytes + 4)
    l128 = ((l + 127) // 128) * 128
    cap = (budget_bytes // per_pos) // 128 * 128
    tile_l = max(128, min(32768, l128, cap))

    b_tile = 1
    if tile_l >= l128:
        # small spatial extent: fold whole batches into the block so each grid
        # step still DMAs a decent payload (target ~1 MiB of logits).
        tile_l = l128
        target_payload = 1 << 20
        for d in range(1, n + 1):
            if n % d:
                continue
            if d * tile_l * per_pos > budget_bytes:
                break
            b_tile = d
            if d * tile_l * c * x_bytes >= target_payload:
                break
    return b_tile, tile_l


def _choose_tile_b(b, c, x_bytes, t_bytes, budget_bytes):
    per_row = 2 * (c * x_bytes + t_bytes + 4)
    b8 = ((b + 7) // 8) * 8
    cap = (budget_bytes // per_row) // 8 * 8
    return max(8, min(8192, b8, cap))


# ---------------------------------------------------------------------------
# public wrapper (mirrors MySoftmaxCrossEntropyLoss.forward, mean reduction)
# ---------------------------------------------------------------------------

def softmax_cross_entropy_loss(inputs, target, nbclasses):
    """inputs: (N, C, *spatial) or (B, C); target: (N, *spatial) or (B,) int.

    Returns scalar float32 mean cross-entropy (== torch CrossEntropyLoss mean).
    """
    # TODO(synk): torch ignore_index (-100) semantics are not handled; targets
    # are assumed to lie in [0, nbclasses) (matches the module's usage).

    # Narrow integer targets (int8/int16/int32) pass through untouched (saves
    # HBM bandwidth); floats / 64-bit ints are normalized to int32.
    if (not jnp.issubdtype(target.dtype, jnp.integer)) or target.dtype.itemsize > 4:
        target = target.astype(jnp.int32)

    phys_vmem = _tpu_vmem_bytes()
    budget = min(phys_vmem // 3, 40 << 20)               # double-buffered working set
    vmem_limit = int(min(phys_vmem * 3 // 4, 96 << 20))  # raise v5e's 16 MiB default

    if inputs.ndim > 2:
        # ---- segmentation path: (N, C, L), class on sublanes, L lane-dense ----
        n = inputs.shape[0]
        x = inputs.reshape(n, nbclasses, -1)              # free view, no transpose/pad
        l = x.shape[-1]
        t = target.reshape(n, 1, l)

        b_tile, tile_l = _choose_tiles_nd(
            n, nbclasses, l, x.dtype.itemsize, t.dtype.itemsize, budget)
        n_l_tiles = -(-l // tile_l)
        grid = (n // b_tile, n_l_tiles)
        valid_l = l if (l % tile_l) else None             # mask only when needed

        kernel = functools.partial(_ce_nd_kernel, tile_l=tile_l, valid_l=valid_l)

        losses = pl.pallas_call(
            kernel,
            out_shape=jax.ShapeDtypeStruct((n, 1, n_l_tiles * tile_l), jnp.float32),
            grid_spec=pltpu.PrefetchScalarGridSpec(
                num_scalar_prefetch=0,
                grid=grid,
                in_specs=[
                    pl.BlockSpec((b_tile, nbclasses, tile_l), lambda i, j: (i, 0, j)),
                    pl.BlockSpec((b_tile, 1, tile_l), lambda i, j: (i, 0, j)),
                ],
                out_specs=pl.BlockSpec((b_tile, 1, tile_l), lambda i, j: (i, 0, j)),
            ),
            compiler_params=pltpu.CompilerParams(
                dimension_semantics=("parallel", "parallel"),
                vmem_limit_bytes=vmem_limit),
        )(x, t)
        total = n * l
    else:
        # ---- classification path: (B, C) row-major, no host-side transpose ----
        x = inputs.reshape(-1, nbclasses)
        b = x.shape[0]
        t = target.reshape(b, 1)

        tile_b = _choose_tile_b(b, nbclasses, x.dtype.itemsize, t.dtype.itemsize, budget)
        grid = (-(-b // tile_b),)

        losses = pl.pallas_call(
            _ce_rowmajor_kernel,
            out_shape=jax.ShapeDtypeStruct((b, 1), jnp.float32),
            grid_spec=pltpu.PrefetchScalarGridSpec(
                num_scalar_prefetch=0,
                grid=grid,
                in_specs=[
                    pl.BlockSpec((tile_b, nbclasses), lambda i: (i, 0)),
                    pl.BlockSpec((tile_b, 1), lambda i: (i, 0)),
                ],
                out_specs=pl.BlockSpec((tile_b, 1), lambda i: (i, 0)),
            ),
            compiler_params=pltpu.CompilerParams(
                dimension_semantics=("parallel",),
                vmem_limit_bytes=vmem_limit),
        )(x, t)
        total = b

    # tiny epilogue reduction + mean in plain JAX (padded positions are 0)
    return jnp.sum(losses) / jnp.float32(total)


# ---------------------------------------------------------------------------
# pure-JAX reference (same math as torch CrossEntropyLoss, mean reduction)
# ---------------------------------------------------------------------------

def _reference_loss(inputs, target, nbclasses):
    if inputs.ndim > 2:
        n, c = inputs.shape[0], inputs.shape[1]
        x = inputs.reshape(n, c, -1).transpose(0, 2, 1).reshape(-1, nbclasses)
    else:
        x = inputs.reshape(-1, nbclasses)
    t = target.reshape(-1).astype(jnp.int32)
    logp = jax.nn.log_softmax(x.astype(jnp.float32), axis=-1)
    return -jnp.mean(jnp.take_along_axis(logp, t[:, None], axis=-1))


if __name__ == "__main__":
    key = jax.random.PRNGKey(0)
    k1, k2, k3, k4 = jax.random.split(key, 4)

    # segmentation-style 4D path: (N, C, H, W)
    N, C, H, W = 2, 4, 16, 16
    inputs = jax.random.normal(k1, (N, C, H, W), dtype=jnp.float32)
    target = jax.random.randint(k2, (N, H, W), 0, C, dtype=jnp.int32)
    loss = jax.block_until_ready(softmax_cross_entropy_loss(inputs, target, C))
    ref = _reference_loss(inputs, target, C)
    assert jnp.allclose(loss, ref, atol=1e-5, rtol=1e-5), (loss, ref)

    # classification-style 2D path: (B, C), no host transpose
    B, C2 = 64, 8
    inputs2 = jax.random.normal(k3, (B, C2), dtype=jnp.float32)
    target2 = jax.random.randint(k4, (B,), 0, C2, dtype=jnp.int32)
    loss2 = jax.block_until_ready(softmax_cross_entropy_loss(inputs2, target2, C2))
    ref2 = _reference_loss(inputs2, target2, C2)
    assert jnp.allclose(loss2, ref2, atol=1e-5, rtol=1e-5), (loss2, ref2)

    print("KERNEL_OK")
</pallas_src>

<mosaic_0001>
module attributes {stable_mosaic.version = 11 : i64} {
  func.func @_ce_nd_kernel(%arg0: i32, %arg1: i32, %arg2: memref<2x4x256xf32, #tpu.memory_space<vmem>>, %arg3: memref<2x1x256xi32, #tpu.memory_space<vmem>>, %arg4: memref<2x1x256xf32, #tpu.memory_space<vmem>>) attributes {dimension_semantics = [#tpu.dimension_semantics<parallel>, #tpu.dimension_semantics<parallel>], iteration_bounds = array<i64: 1, 1>, scalar_prefetch = 0 : i64, scratch_operands = 0 : i64, tpu.core_type = #tpu.core_type<tc>, window_params = [{transform_indices = @transform_0, window_bounds = array<i64: 2, 4, 256>}, {transform_indices = @transform_1, window_bounds = array<i64: 2, 1, 256>}, {transform_indices = @transform_2, window_bounds = array<i64: 2, 1, 256>}]} {
    %c0 = arith.constant 0 : index
    %c0_0 = arith.constant 0 : index
    %c0_1 = arith.constant 0 : index
    %0 = vector.load %arg2[%c0, %c0_0, %c0_1] : memref<2x4x256xf32, #tpu.memory_space<vmem>>, vector<2x4x256xf32>
    %c0_2 = arith.constant 0 : index
    %c0_3 = arith.constant 0 : index
    %c0_4 = arith.constant 0 : index
    %1 = vector.load %arg3[%c0_2, %c0_3, %c0_4] : memref<2x1x256xi32, #tpu.memory_space<vmem>>, vector<2x1x256xi32>
    %cst = arith.constant dense<0xFF800000> : vector<2x256xf32>
    %2 = vector.multi_reduction <maximumf>, %0, %cst [1] : vector<2x4x256xf32> to vector<2x256xf32>
    %3 = vector.shape_cast %2 : vector<2x256xf32> to vector<2x1x256xf32>
    %4 = vector.broadcast %3 : vector<2x1x256xf32> to vector<2x4x256xf32>
    %5 = arith.subf %0, %4 : vector<2x4x256xf32>
    %6 = math.exp %5 : vector<2x4x256xf32>
    %cst_5 = arith.constant dense<0.000000e+00> : vector<2x256xf32>
    %7 = vector.multi_reduction <add>, %6, %cst_5 [1] : vector<2x4x256xf32> to vector<2x256xf32>
    %8 = vector.shape_cast %7 : vector<2x256xf32> to vector<2x1x256xf32>
    %9 = math.log %8 : vector<2x1x256xf32>
    %10 = tpu.iota {dimensions = array<i32: 1>} : vector<2x4x256xi32>
    %11 = vector.broadcast %1 : vector<2x1x256xi32> to vector<2x4x256xi32>
    %12 = arith.cmpi eq, %10, %11 : vector<2x4x256xi32>
    %cst_6 = arith.constant 0.000000e+00 : f32
    %13 = vector.broadcast %cst_6 : f32 to vector<2x4x256xf32>
    %14 = arith.select %12, %5, %13 : vector<2x4x256xi1>, vector<2x4x256xf32>
    %cst_7 = arith.constant dense<0.000000e+00> : vector<2x256xf32>
    %15 = vector.multi_reduction <add>, %14, %cst_7 [1] : vector<2x4x256xf32> to vector<2x256xf32>
    %16 = vector.shape_cast %15 : vector<2x256xf32> to vector<2x1x256xf32>
    %17 = arith.subf %9, %16 : vector<2x1x256xf32>
    %c0_8 = arith.constant 0 : index
    %c0_9 = arith.constant 0 : index
    %c0_10 = arith.constant 0 : index
    %18 = vector.load %arg4[%c0_8, %c0_9, %c0_10] : memref<2x1x256xf32, #tpu.memory_space<vmem>>, vector<2x1x256xf32>
    tpu.vector_store %arg4[%c0_8, %c0_9, %c0_10], %17 {strides = array<i32>} : memref<2x1x256xf32, #tpu.memory_space<vmem>>, vector<2x1x256xf32>,
    return
  }
  func.func @transform_0(%arg0: i32, %arg1: i32) -> (i32, i32, i32) {
    %c0_i32 = arith.constant 0 : i32
    %c0_i32_0 = arith.constant 0 : i32
    return %arg0, %c0_i32, %arg1 : i32, i32, i32
  }
  func.func @transform_1(%arg0: i32, %arg1: i32) -> (i32, i32, i32) {
    %c0_i32 = arith.constant 0 : i32
    %c0_i32_0 = arith.constant 0 : i32
    return %arg0, %c0_i32, %arg1 : i32, i32, i32
  }
  func.func @transform_2(%arg0: i32, %arg1: i32) -> (i32, i32, i32) {
    %c0_i32 = arith.constant 0 : i32
    %c0_i32_0 = arith.constant 0 : i32
    return %arg0, %c0_i32, %arg1 : i32, i32, i32
  }
}

</mosaic_0001>

<bundles_post_ra>
// kernel: tpu_custom_call.1
= control target key start
LH: loop header
LB: loop body
LE: loop exit
PB: predicated region body
PF: predicated region fallthrough
CT: control target
= control target key end

     0   :  { %7 = vsyncpa [#allocation3], 0  ;;  %s441_s0 = inlined_call_operand.hbm [shape: f32[2,4,256], index: 0, kind: input, shape index: {}]   ;;  %s442_s1 = inlined_call_operand.hbm [shape: s32[2,1,256], index: 1, kind: input, shape index: {}]   ;;  %s443_s2 = inlined_call_operand.hbm [shape: f32[2,1,256], index: 2, kind: output, shape index: {}]  }
   0x1   :  { %8 = vsyncpa [#allocation6], 0 }
   0x2   :  { %9 = vsyncpa [#allocation4], 0  ;;  %s353_s9 = smov [#allocation2]   ;;  %s281_s13 = scalar_lea.hbm %s441_s0, 256 }
   0x3   :  { %s15_s10 = sshll.u32 %s353_s9, 4  ;;  %p282_p0 = scmp.ne.s32.totalorder %s441_s0, %s281_s13  ;;  %s16_s10 = int_to_ptr.vmem [resolvable:$true] %s15_s10 }
   0x4   :  { %p285_p1 = scmp.lt.u32.totalorder %s281_s13, %s441_s0 }
   0x6   :  { %p287_p2 = pnand %p285_p1, %p282_p0 }
   0x8   :  { %290 = shalt.err (!%p287_p2)
}
   0x9   :  { %s291_s18 = scalar_lea.vmem %s16_s10, 256  ;;  %p296_p4 = scmp.lt.s32.totalorder %s16_s10, %s16_s10 }
   0xa   :  { %p292_p3 = scmp.ne.s32.totalorder %s16_s10, %s291_s18  ;;  %p297_p5 = scmp.lt.s32.totalorder %s291_s18, %s291_s18 }
   0xc   :  { %p298_p6 = por %p297_p5, %p296_p4 }
   0xe   :  { %p299_p7 = pnand %p298_p6, %p292_p3 }
  0x10   :  { %302 = shalt.err (!%p299_p7)
}
  0x11   :  { %s354_s19 = smov 128   ;;  %s355_s20 = smov 8  }
  0x12   :  { %21 = dma.hbm_to_vmem [thread:$0]  %s441_s0, 256, %s16_s10, [#allocation3], %s354_s19, %s354_s19, %s355_s20  }
  0x13   :  { %s356_s23 = smov [#allocation5]   ;;  %s303_s27 = scalar_lea.hbm %s442_s1, 64 }
  0x14   :  { %s27_s24 = sshll.u32 %s356_s23, 4  ;;  %p304_p8 = scmp.ne.s32.totalorder %s442_s1, %s303_s27  ;;  %s28_s24 = int_to_ptr.vmem [resolvable:$true] %s27_s24 }
  0x15   :  { %p307_p9 = scmp.lt.u32.totalorder %s303_s27, %s442_s1 }
  0x17   :  { %p309_p10 = pnand %p307_p9, %p304_p8 }
  0x19   :  { %312 = shalt.err (!%p309_p10)
}
  0x1a   :  { %s313_s4 = scalar_lea.vmem %s28_s24, 64  ;;  %p318_p12 = scmp.lt.s32.totalorder %s28_s24, %s28_s24 }
  0x1b   :  { %p314_p11 = scmp.ne.s32.totalorder %s28_s24, %s313_s4  ;;  %p319_p13 = scmp.lt.s32.totalorder %s313_s4, %s313_s4 }
  0x1d   :  { %p320_p0 = por %p319_p13, %p318_p12 }
  0x1f   :  { %p321_p1 = pnand %p320_p0, %p314_p11 }
  0x21   :  { %324 = shalt.err (!%p321_p1)
}
  0x22   :  { %s357_s0 = smov 32   ;;  %s358_s5 = smov 2  }
  0x23   :  { %33 = dma.hbm_to_vmem [thread:$0]  %s442_s1, 64, %s28_s24, [#allocation6], %s357_s0, %s357_s0, %s358_s5  }
  0x24   :  { %347 = dma.done.wait [#allocation3], 256  }
  0x25   :  { %348 = vsyncadd [#allocation3], 4294967040 }
  0x26   :  { %349 = dma.done.wait [#allocation6], 64  }
  0x27   :  { %350 = vsyncadd [#allocation6], 4294967232  ;;  %vm50_vm0 = vcmask 1043456   ;;  %v40_v0 = vld [vmem:[#allocation2] sm:$0xff]  ;;  %v41_v1 = vld [vmem:[#allocation2 + $0x8] sm:$0xff]  ;;  %v135_v24 = vlaneseq  ;;  %s360_s1 = smov [#allocation7]  }
  0x28   :  { %v46_v2 = vcombine.high %v40_v0, %v40_v0  ;;  %v51_v3 = vsel %vm50_vm0, %v40_v0, -inf  ;;  %v47_v5 = vcombine.high %v41_v1, %v41_v1  ;;  %v65_v6 = vsel %vm50_vm0, %v41_v1, -inf  ;;  %v42_v38 = vld [vmem:[#allocation5] sm:$0x3]  ;;  %v43_v42 = vld [vmem:[#allocation5 + $0x2] sm:$0x3] }
  0x29   :  { %v52_v4 = vrot.slane %v51_v3, 4  ;;  %v66_v8 = vrot.slane %v65_v6, 4  ;;  %v408_v32 = vshrl.u32 %v135_v24, 7  ;;  %s246_s8 = sshll.u32 %s360_s1, 4  ;;  %vm237_vm5 = vcmp.lt.s32.totalorder %v135_v24, 256  ;;  %s247_s8 = int_to_ptr.vmem [resolvable:$true] %s246_s8 }
  0x2a   :  { %v58_v7 = vsel %vm50_vm0, %v46_v2, -inf  ;;  %v72_v11 = vsel %vm50_vm0, %v47_v5, -inf  ;;  %s325_s9 = scalar_lea.vmem %s247_s8, 64  ;;  %p330_p3 = scmp.lt.s32.totalorder %s247_s8, %s247_s8 }
  0x2b   :  { %v53_v9 = vmax.f32 %v51_v3, %v52_v4  ;;  %v59_v10 = vrot.slane %v58_v7, 4  ;;  %v67_v12 = vmax.f32 %v65_v6, %v66_v8  ;;  %v73_v13 = vrot.slane %v72_v11, 4  ;;  %p326_p2 = scmp.ne.s32.totalorder %s247_s8, %s325_s9  ;;  %p331_p4 = scmp.lt.s32.totalorder %s325_s9, %s325_s9 }
  0x2c   :  { %v139_v37 = vsub.s32 0, %v408_v32  ;;  %v143_v41 = vsub.s32 1, %v408_v32 }
  0x2d   :  { %v54_v14 = vrot.slane %v53_v9, 2  ;;  %v60_v15 = vmax.f32 %v58_v7, %v59_v10  ;;  %v68_v16 = vrot.slane %v67_v12, 2  ;;  %v74_v17 = vmax.f32 %v72_v11, %v73_v13  ;;  %p332_p5 = por %p331_p4, %p330_p3 }
  0x2e   :  { %v140_v44 = vrot.slane %v42_v38, %v139_v37  ;;  %v148_v45 = vrot.slane %v43_v42, %v139_v37  ;;  %v144_v46 = vrot.slane %v42_v38, %v143_v41  ;;  %v152_v47 = vrot.slane %v43_v42, %v143_v41 }
  0x2f   :  { %v55_v18 = vmax.f32 %v53_v9, %v54_v14  ;;  %v61_v19 = vrot.slane %v60_v15, 2  ;;  %v69_v20 = vmax.f32 %v67_v12, %v68_v16  ;;  %v75_v21 = vrot.slane %v74_v17, 2  ;;  %p333_p6 = pnand %p332_p5, %p326_p2 }
  0x30   :  { %vm153_vm1 = vcmp.eq.s32.totalorder %v408_v32, %v140_v44  ;;  %vm155_vm2 = vcmp.eq.s32.totalorder %v408_v32, %v148_v45  ;;  %vm154_vm3 = vcmp.eq.s32.totalorder %v408_v32, %v144_v46  ;;  %vm156_vm4 = vcmp.eq.s32.totalorder %v408_v32, %v152_v47 }
  0x31   :  { %v56_v22 = vrot.slane %v55_v18, 1  ;;  %v62_v23 = vmax.f32 %v60_v15, %v61_v19  ;;  %v70_v25 = vrot.slane %v69_v20, 1  ;;  %v76_v26 = vmax.f32 %v74_v17, %v75_v21 }
  0x32   :  { %v359_v47 = vmov 1966171168  }
  0x33   :  { %v57_v27 = vmax.f32 %v55_v18, %v56_v22  ;;  %v63_v28 = vrot.slane %v62_v23, 1  ;;  %v71_v29 = vmax.f32 %v69_v20, %v70_v25  ;;  %v77_v30 = vrot.slane %v76_v26, 1 }
  0x35   :  { %v64_v31 = vmax.f32 %v62_v23, %v63_v28  ;;  %v78_v33 = vmax.f32 %v76_v26, %v77_v30 }
  0x37   :  { %v83_v34 = vcombine.low %v57_v27, %v64_v31  ;;  %v84_v35 = vcombine.low %v71_v29, %v78_v33 }
  0x39   :  { %v87_v36 = vsub.f32 %v40_v0, %v83_v34  ;;  %v88_v39 = vsub.f32 %v41_v1, %v84_v35 }
  0x3b   :  { %v89_v40 = vmul.f32 1.442695, %v87_v36  ;;  %v91_v43 = vmul.f32 1.442695, %v88_v39  ;;  %v159_v48 = vcombine.high %v87_v36, %v87_v36  ;;  %v160_v49 = vcombine.high %v88_v39, %v88_v39 }
  0x3c   :  { %v163_v50 = vsel %vm153_vm1, %v87_v36, 0.0  ;;  %v165_v51 = vsel %vm155_vm2, %v88_v39, 0.0 }
  0x3d   :  { %269 = vpow2.f32 %v89_v40  ;;  %v164_v52 = vsel %vm154_vm3, %v159_v48, 0.0  ;;  %v167_v54 = vsel %vm50_vm0, %v163_v50, 0.0  ;;  %v166_v55 = vsel %vm156_vm4, %v160_v49, 0.0 }
  0x3e   :  { %271 = vpow2.f32 %v91_v43  ;;  %v181_v59 = vsel %vm50_vm0, %v165_v51, 0.0  ;;  %v174_v61 = vsel %vm50_vm0, %v164_v52, 0.0  ;;  %v168_v1 = vrot.slane %v167_v54, 4 }
  0x3f   :  { %v188_v3 = vsel %vm50_vm0, %v166_v55, 0.0  ;;  %v182_v7 = vrot.slane %v181_v59, 4  ;;  %v175_v8 = vrot.slane %v174_v61, 4  ;;  %v205_v48 = vunpack.c.l.s4 %v359_v47 }
  0x40   :  { %v189_v13 = vrot.slane %v188_v3, 4  ;;  %v169_v14 = vadd.f32 %v168_v1, %v167_v54 }
  0x41   :  { %v183_v19 = vadd.f32 %v182_v7, %v181_v59  ;;  %v176_v20 = vadd.f32 %v175_v8, %v174_v61 }
  0x42   :  { %v190_v26 = vadd.f32 %v189_v13, %v188_v3  ;;  %v170_v27 = vrot.slane %v169_v14, 2 }
  0x43   :  { %v184_v33 = vrot.slane %v183_v19, 2  ;;  %v177_v34 = vrot.slane %v176_v20, 2 }
  0x44   :  { %v191_v38 = vrot.slane %v190_v26, 2  ;;  %v171_v39 = vadd.f32 %v170_v27, %v169_v14 }
  0x45   :  { %v185_v41 = vadd.f32 %v184_v33, %v183_v19  ;;  %v178_v42 = vadd.f32 %v177_v34, %v176_v20 }
  0x46   :  { %v192_v43 = vadd.f32 %v191_v38, %v190_v26  ;;  %v172_v44 = vrot.slane %v171_v39, 1 }
  0x47   :  { %v270_v53 = vpop.eup %269  ;;  %v186_v45 = vrot.slane %v185_v41, 1  ;;  %v179_v46 = vrot.slane %v178_v42, 1 }
  0x48   :  { %v272_v56 = vpop.eup %271  ;;  %v95_v57 = vcombine.high %v270_v53, %v270_v53  ;;  %v99_v58 = vsel %vm50_vm0, %v270_v53, 0.0  ;;  %v193_v49 = vrot.slane %v192_v43, 1  ;;  %v173_v50 = vadd.f32 %v172_v44, %v171_v39 }
  0x49   :  { %v100_v60 = vrot.slane %v99_v58, 4  ;;  %v96_v62 = vcombine.high %v272_v56, %v272_v56  ;;  %v113_v63 = vsel %vm50_vm0, %v272_v56, 0.0  ;;  %v187_v52 = vadd.f32 %v186_v45, %v185_v41 }
  0x4a   :  { %v106_v0 = vsel %vm50_vm0, %v95_v57, 0.0  ;;  %v114_v2 = vrot.slane %v113_v63, 4  ;;  %v180_v55 = vadd.f32 %v179_v46, %v178_v42  ;;  %v206_v56 = vunpack.c.0.s8 %v205_v48 }
  0x4b   :  { %v101_v4 = vadd.f32 %v100_v60, %v99_v58  ;;  %v107_v5 = vrot.slane %v106_v0, 4  ;;  %v120_v6 = vsel %vm50_vm0, %v96_v62, 0.0  ;;  %v194_v59 = vadd.f32 %v193_v49, %v192_v43 }
  0x4c   :  { %v115_v9 = vadd.f32 %v114_v2, %v113_v63  ;;  %v121_v10 = vrot.slane %v120_v6, 4  ;;  %v209_v2 = vsub.s32 %v206_v56, %v408_v32 }
  0x4d   :  { %v102_v11 = vrot.slane %v101_v4, 2  ;;  %v108_v12 = vadd.f32 %v107_v5, %v106_v0 }
  0x4e   :  { %v116_v15 = vrot.slane %v115_v9, 2  ;;  %v122_v16 = vadd.f32 %v121_v10, %v120_v6 }
  0x4f   :  { %v103_v17 = vadd.f32 %v102_v11, %v101_v4  ;;  %v109_v18 = vrot.slane %v108_v12, 2 }
  0x50   :  { %v117_v21 = vadd.f32 %v116_v15, %v115_v9  ;;  %v123_v22 = vrot.slane %v122_v16, 2 }
  0x51   :  { %v104_v23 = vrot.slane %v103_v17, 1  ;;  %v110_v25 = vadd.f32 %v109_v18, %v108_v12 }
  0x52   :  { %v118_v28 = vrot.slane %v117_v21, 1  ;;  %v124_v29 = vadd.f32 %v123_v22, %v122_v16 }
  0x53   :  { %v105_v30 = vadd.f32 %v104_v23, %v103_v17  ;;  %v111_v31 = vrot.slane %v110_v25, 1 }
  0x54   :  { %v119_v35 = vadd.f32 %v118_v28, %v117_v21  ;;  %v125_v36 = vrot.slane %v124_v29, 1 }
  0x55   :  { %v112_v37 = vadd.f32 %v111_v31, %v110_v25  ;;  %273 = vlog2.f32 %v105_v30 }
  0x56   :  { %v126_v40 = vadd.f32 %v125_v36, %v124_v29  ;;  %275 = vlog2.f32 %v119_v35 }
  0x57   :  { %277 = vlog2.f32 %v112_v37 }
  0x58   :  { %279 = vlog2.f32 %v126_v40 }
  0x5f   :  { %v274_v51 = vpop.eup %273 }
  0x60   :  { %v276_v53 = vpop.eup %275  ;;  %v128_v54 = vmul.f32 0.6931472, %v274_v51 }
  0x61   :  { %v278_v57 = vpop.eup %277  ;;  %v132_v58 = vmul.f32 0.6931472, %v276_v53 }
  0x62   :  { %v280_v60 = vpop.eup %279  ;;  %v130_v61 = vmul.f32 0.6931472, %v278_v57  ;;  %v195_v62 = vsub.f32 %v128_v54, %v173_v50 }
  0x63   :  { %v134_v63 = vmul.f32 0.6931472, %v280_v60  ;;  %v197_v0 = vsub.f32 %v132_v58, %v187_v52 }
  0x64   :  { %v196_v1 = vsub.f32 %v130_v61, %v180_v55 }
  0x65   :  { %v198_v3 = vsub.f32 %v134_v63, %v194_v59 }
  0x66   :  { %v203_v4 = vcombine.low %v195_v62, %v196_v1 }
  0x67   :  { %v218_v5 = vcombine.low %v197_v0, %v198_v3 }
  0x68   :  { %v210_v6 = vrot.slane %v203_v4, %v209_v2 }
  0x69   :  { %v225_v7 = vrot.slane %v218_v5, %v209_v2 }
  0x6a   :  { %v217_v8 = vrot.slane %v210_v6, %v209_v2 }
  0x6b   :  { %v232_v9 = vrot.slane %v225_v7, %v209_v2 }
  0x6c   :  { %239 = vst.msk [vmem:[#allocation7] sm:$0x3] %vm237_vm5, %v217_v8 }
  0x6d   :  { %240 = vst.msk [vmem:[#allocation7 + $0x2] sm:$0x3] %vm237_vm5, %v232_v9 }
  0x6e   :  { %336 = shalt.err (!%p333_p6)
}
  0x6f   :  { %s337_s12 = scalar_lea.hbm %s443_s2, 64 }
  0x70   :  { %p338_p7 = scmp.ne.s32.totalorder %s443_s2, %s337_s12  ;;  %p341_p8 = scmp.lt.u32.totalorder %s337_s12, %s443_s2 }
  0x72   :  { %p343_p9 = pnand %p341_p8, %p338_p7 }
  0x74   :  { %346 = shalt.err (!%p343_p9)
}
  0x75   :  { %252 = dma.vmem_to_hbm [thread:$0]  %s247_s8, 64, %s443_s2, [#allocation4], %s357_s0, %s357_s0, %s358_s5  }
  0x76   :  { %351 = dma.done.wait [#allocation4], 64  }
  0x77   :  { %352 = vsyncadd [#allocation4], 4294967232 }
  0x78   :  { %256 = vsyncpa [#allocation3], 1 }
  0x79   :  { %257 = vsyncpa [#allocation6], 1 }
  0x7a   :  { %258 = vsyncpa [#allocation4], 1 }

</bundles_post_ra>
